<compile_context>
chip_gen: v7x
topology: tpu7x:2x2x1
jax: 0.10.0
libtpu: 0.0.40
codegen_flags: <defaults>
</compile_context>

<pallas_src>
import functools

import jax
import jax.numpy as jnp
from jax.experimental import pallas as pl
from jax.experimental.pallas import tpu as pltpu


def _round_up(x, m):
    return (x + m - 1) // m * m


def _fc_tile(vp):
    for t in (512, 256, 128):
        if vp % t == 0:
            return t
    return vp


# --------------------------------------------------------------------------- #
# Kernel 1: fused embedding-gather + LSTM recurrence -> batch-major hidden states
# --------------------------------------------------------------------------- #
def lstm_recurrence_kernel(ids_ref, gate_tbl_ref, w_hh_ref, hs_ref, xg_scr, *, T, B):
    """Whole-sequence LSTM recurrence with in-kernel embedding gather.

    ids_ref     : SMEM (T*B,) int32   scalar-prefetched token ids, row = t*B + b
    gate_tbl_ref: VMEM (V, 4H)        precomputed emb @ W_ih + (b_ih+b_hh), gates [i,f,o,g]
    w_hh_ref    : VMEM (H, 4H)        recurrent weights, gates [i,f,o,g]
    hs_ref      : VMEM (B*T, H) out   hidden states, BATCH-major (row = b*T + t)
    xg_scr      : VMEM (T*B, 4H)      scratch for the gathered input-side gate rows
    """
    H = w_hh_ref.shape[0]

    # Fused embedding gather: xg[r] = gate_tbl[ids[r]]  (bias already folded in).
    for r in range(T * B):
        tok = ids_ref[r]
        xg_scr[pl.ds(r, 1), :] = gate_tbl_ref[pl.ds(tok, 1), :]

    h = jnp.zeros((B, H), jnp.float32)
    c = jnp.zeros((B, H), jnp.float32)

    # Fully unrolled recurrence (T small & static).
    # TODO(synk): for large T use lax.fori_loop(..., unroll=4..8) over the VMEM
    #             scratches instead of a full unroll.
    for t in range(T):
        # Per-step loads from VMEM (not SSA values held live across the unroll).
        gates = xg_scr[t * B:(t + 1) * B, :] + jnp.dot(
            h, w_hh_ref[...], preferred_element_type=jnp.float32)        # (B, 4H)
        sig = jax.nn.sigmoid(gates[:, 0:3 * H])        # [i | f | o] in one EUP slab
        g_g = jnp.tanh(gates[:, 3 * H:4 * H])
        c = sig[:, H:2 * H] * c + sig[:, 0:H] * g_g
        h = sig[:, 2 * H:3 * H] * jnp.tanh(c)
        # Batch-major store at the H-wide stage -> no V-wide logits transpose later.
        # TODO(synk): for B >= 8, group rows into full (8,128) tiles before storing;
        #             at B=2 these are tiny masked stores.
        for b in range(B):
            hs_ref[pl.ds(b * T + t, 1), :] = h[b:b + 1, :]


# --------------------------------------------------------------------------- #
# Kernel 2: output projection, tiled over the (lane-dense, padded) vocab axis
# --------------------------------------------------------------------------- #
def fc_kernel(hs_ref, w_fc_ref, b_fc_ref, out_ref):
    """(B*T, H) @ (H, tV) tile of the fc projection; bf16 MXU operands, f32 accum."""
    # TODO(synk): for many V tiles, pre-cast hs to bf16 once (kernel-1 output dtype)
    #             to avoid the per-tile recast.
    out_ref[...] = (jnp.dot(hs_ref[...].astype(jnp.bfloat16), w_fc_ref[...],
                            preferred_element_type=jnp.float32)
                    + b_fc_ref[...])


# --------------------------------------------------------------------------- #
# One-time parameter preprocessing (no per-call reorder / pad / cast)
# --------------------------------------------------------------------------- #
def prepare_params(params):
    emb, w_ih, w_hh, b = params["embedding"], params["w_ih"], params["w_hh"], params["b"]
    w_fc, b_fc = params["w_fc"], params["b_fc"]
    H = w_hh.shape[0]
    V = emb.shape[0]
    Vp = _round_up(V, 128)

    def reorder(w):   # PyTorch gate order [i, f, g, o] -> [i, f, o, g]
        return jnp.concatenate(
            [w[..., 0:2 * H], w[..., 3 * H:4 * H], w[..., 2 * H:3 * H]], axis=-1)

    # embedding + eval-dropout (identity) + x @ W_ih + bias folded into one table.
    gate_tbl = (emb @ reorder(w_ih) + reorder(b)).astype(jnp.float32)    # (V, 4H)
    return {
        "gate_tbl": gate_tbl,
        "w_hh": reorder(w_hh).astype(jnp.float32),
        "w_fc": jnp.pad(w_fc, ((0, 0), (0, Vp - V))).astype(jnp.bfloat16),  # pre-cast once
        "b_fc": jnp.pad(b_fc, ((0, 0), (0, Vp - V))).astype(jnp.float32),
    }


@jax.jit
def lstm_module_forward(x_ids, prep):
    """x_ids: (B, T) int32 token ids -> logits (B, T, V) float32 (eval-mode dropout)."""
    gate_tbl, w_hh = prep["gate_tbl"], prep["w_hh"]
    w_fc, b_fc = prep["w_fc"], prep["b_fc"]
    B, T = x_ids.shape
    V, G4 = gate_tbl.shape
    H = w_hh.shape[0]
    Vp = w_fc.shape[1]

    ids = x_ids.T.reshape(T * B).astype(jnp.int32)    # time-major flat ids (row = t*B + b)

    # Kernel 1: fused gather + recurrence.
    hs = pl.pallas_call(
        functools.partial(lstm_recurrence_kernel, T=T, B=B),
        out_shape=jax.ShapeDtypeStruct((B * T, H), jnp.float32),
        grid_spec=pltpu.PrefetchScalarGridSpec(
            num_scalar_prefetch=1,
            grid=(1,),
            in_specs=[
                pl.BlockSpec((V, G4), lambda i, ids_ref: (0, 0)),
                pl.BlockSpec((H, G4), lambda i, ids_ref: (0, 0)),
            ],
            out_specs=pl.BlockSpec((B * T, H), lambda i, ids_ref: (0, 0)),
            scratch_shapes=[pltpu.VMEM((T * B, G4), jnp.float32)],
        ),
        compiler_params=pltpu.CompilerParams(dimension_semantics=("arbitrary",)),
    )(ids, gate_tbl, w_hh)

    # Kernel 2: fc projection tiled over Vp ("parallel" -> shards across v7x's 2 TCs,
    # streams w_fc with double buffering instead of one giant VMEM block).
    tV = _fc_tile(Vp)
    logits = pl.pallas_call(
        fc_kernel,
        out_shape=jax.ShapeDtypeStruct((B * T, Vp), jnp.float32),
        grid_spec=pltpu.PrefetchScalarGridSpec(
            num_scalar_prefetch=0,
            grid=(Vp // tV,),
            in_specs=[
                pl.BlockSpec((B * T, H), lambda j: (0, 0)),
                pl.BlockSpec((H, tV), lambda j: (0, j)),
                pl.BlockSpec((1, tV), lambda j: (0, j)),
            ],
            out_specs=pl.BlockSpec((B * T, tV), lambda j: (0, j)),
        ),
        compiler_params=pltpu.CompilerParams(
            dimension_semantics=("parallel",),
            vmem_limit_bytes=32 * 1024 * 1024),   # v5e default scoped VMEM is only 16 MiB
    )(hs, w_fc, b_fc)

    # Rows are already batch-major (b*T + t): strip lane padding and reshape. No transpose.
    return logits[:, :V].reshape(B, T, V)


# --------------------------------------------------------------------------- #
# Pure-JAX reference (same math, lax.scan, original PyTorch gate order)
# --------------------------------------------------------------------------- #
def reference_forward(x_ids, params):
    emb, w_ih, w_hh, b = params["embedding"], params["w_ih"], params["w_hh"], params["b"]
    w_fc, b_fc = params["w_fc"], params["b_fc"]
    H = w_hh.shape[0]
    x = jnp.take(emb, x_ids, axis=0)                 # (B, T, F)
    B = x.shape[0]

    def step(carry, x_t):
        h, c = carry
        gates = x_t @ w_ih + h @ w_hh + b
        i = jax.nn.sigmoid(gates[:, 0:H])
        f = jax.nn.sigmoid(gates[:, H:2 * H])
        g = jnp.tanh(gates[:, 2 * H:3 * H])
        o = jax.nn.sigmoid(gates[:, 3 * H:4 * H])
        c = f * c + i * g
        h = o * jnp.tanh(c)
        return (h, c), h

    h0 = jnp.zeros((B, H), jnp.float32)
    c0 = jnp.zeros((B, H), jnp.float32)
    _, hs = jax.lax.scan(step, (h0, c0), jnp.transpose(x, (1, 0, 2)))
    hs = jnp.transpose(hs, (1, 0, 2))                # (B, T, H)
    return hs @ w_fc + b_fc


def init_params(key, num_words, len_feature, len_hidden):
    ks = jax.random.split(key, 7)
    V, F, H = num_words, len_feature, len_hidden
    emb = jax.random.normal(ks[0], (V, F), jnp.float32) * (2.0 / (V + F)) ** 0.5
    s = 1.0 / (H ** 0.5)
    w_ih = jax.random.uniform(ks[1], (F, 4 * H), jnp.float32, -s, s)
    w_hh = jax.random.uniform(ks[2], (H, 4 * H), jnp.float32, -s, s)
    b_ih = jax.random.uniform(ks[3], (4 * H,), jnp.float32, -s, s)
    b_hh = jax.random.uniform(ks[4], (4 * H,), jnp.float32, -s, s)
    w_fc = jax.random.uniform(ks[5], (H, V), jnp.float32, -s, s)
    b_fc = jax.random.uniform(ks[6], (V,), jnp.float32, -s, s)
    return {
        "embedding": emb,
        "w_ih": w_ih,            # PyTorch gate order [i, f, g, o]
        "w_hh": w_hh,
        "b": (b_ih + b_hh)[None, :],
        "w_fc": w_fc,
        "b_fc": b_fc[None, :],
    }


if __name__ == "__main__":
    num_words = 64      # vocab size
    len_feature = 16    # embedding dim
    len_hidden = 32     # LSTM hidden dim
    batch, seq = 2, 8

    key = jax.random.PRNGKey(0)
    k_param, k_data = jax.random.split(key)
    params = init_params(k_param, num_words, len_feature, len_hidden)
    prep = prepare_params(params)     # one-time prep: reorder / fold / pad / cast
    x_ids = jax.random.randint(k_data, (batch, seq), 0, num_words, dtype=jnp.int32)

    logits = lstm_module_forward(x_ids, prep)
    logits = jax.block_until_ready(logits)

    ref = reference_forward(x_ids, params)
    assert logits.shape == (batch, seq, num_words)
    # bf16 MXU operands on the fc loosen the old 1e-4 f32 tolerance (review note).
    assert jnp.allclose(logits, ref, rtol=2e-2, atol=2e-2), "mismatch vs reference"

    print("KERNEL_OK")
</pallas_src>

<mosaic_0001>
module attributes {stable_mosaic.version = 11 : i64} {
  func.func @fc_kernel(%arg0: i32, %arg1: memref<16x32xf32, #tpu.memory_space<vmem>>, %arg2: memref<32x128xbf16, #tpu.memory_space<vmem>>, %arg3: memref<1x128xf32, #tpu.memory_space<vmem>>, %arg4: memref<16x128xf32, #tpu.memory_space<vmem>>) attributes {dimension_semantics = [#tpu.dimension_semantics<parallel>], iteration_bounds = array<i64: 1>, scalar_prefetch = 0 : i64, scratch_operands = 0 : i64, tpu.core_type = #tpu.core_type<tc>, window_params = [{pipeline_mode = #tpu.pipeline_mode<synchronous>, transform_indices = @transform_0, window_bounds = array<i64: 16, 32>}, {transform_indices = @transform_1, window_bounds = array<i64: 32, 128>}, {transform_indices = @transform_2, window_bounds = array<i64: 1, 128>}, {transform_indices = @transform_3, window_bounds = array<i64: 16, 128>}]} {
    %c0 = arith.constant 0 : index
    %c0_0 = arith.constant 0 : index
    %0 = vector.load %arg1[%c0, %c0_0] : memref<16x32xf32, #tpu.memory_space<vmem>>, vector<16x32xf32>
    %1 = arith.truncf %0 : vector<16x32xf32> to vector<16x32xbf16>
    %c0_1 = arith.constant 0 : index
    %c0_2 = arith.constant 0 : index
    %2 = vector.load %arg2[%c0_1, %c0_2] : memref<32x128xbf16, #tpu.memory_space<vmem>>, vector<32x128xbf16>
    %cst = arith.constant dense<0.000000e+00> : vector<16x128xf32>
    %3 = tpu.matmul %1, %2, %cst {dimension_numbers = #tpu.dot_dimension_numbers<[1], [0], [0], [1], [0, 0, 1, 1], [], []>} : vector<16x32xbf16>, vector<32x128xbf16>, vector<16x128xf32> -> vector<16x128xf32>
    %c0_3 = arith.constant 0 : index
    %c0_4 = arith.constant 0 : index
    %4 = vector.load %arg3[%c0_3, %c0_4] : memref<1x128xf32, #tpu.memory_space<vmem>>, vector<1x128xf32>
    %5 = vector.broadcast %4 : vector<1x128xf32> to vector<16x128xf32>
    %6 = arith.addf %3, %5 : vector<16x128xf32>
    %c0_5 = arith.constant 0 : index
    %c0_6 = arith.constant 0 : index
    %7 = vector.load %arg4[%c0_5, %c0_6] : memref<16x128xf32, #tpu.memory_space<vmem>>, vector<16x128xf32>
    tpu.vector_store %arg4[%c0_5, %c0_6], %6 {strides = array<i32>} : memref<16x128xf32, #tpu.memory_space<vmem>>, vector<16x128xf32>,
    return
  }
  func.func @transform_0(%arg0: i32) -> (i32, i32) {
    %c0_i32 = arith.constant 0 : i32
    %c0_i32_0 = arith.constant 0 : i32
    %c0_i32_1 = arith.constant 0 : i32
    return %c0_i32, %c0_i32_0 : i32, i32
  }
  func.func @transform_1(%arg0: i32) -> (i32, i32) {
    %c0_i32 = arith.constant 0 : i32
    %c0_i32_0 = arith.constant 0 : i32
    return %c0_i32, %arg0 : i32, i32
  }
  func.func @transform_2(%arg0: i32) -> (i32, i32) {
    %c0_i32 = arith.constant 0 : i32
    %c0_i32_0 = arith.constant 0 : i32
    return %c0_i32, %arg0 : i32, i32
  }
  func.func @transform_3(%arg0: i32) -> (i32, i32) {
    %c0_i32 = arith.constant 0 : i32
    %c0_i32_0 = arith.constant 0 : i32
    return %c0_i32, %arg0 : i32, i32
  }
}

module attributes {stable_mosaic.version = 11 : i64} {
  func.func @lstm_recurrence_kernel(%arg0: i32, %arg1: memref<16xi32, #tpu.memory_space<smem>>, %arg2: memref<64x128xf32, #tpu.memory_space<vmem>>, %arg3: memref<32x128xf32, #tpu.memory_space<vmem>>, %arg4: memref<16x32xf32, #tpu.memory_space<vmem>>, %arg5: memref<16x128xf32, #tpu.memory_space<vmem>>) attributes {dimension_semantics = [#tpu.dimension_semantics<arbitrary>], iteration_bounds = array<i64: 1>, scalar_prefetch = 1 : i64, scratch_operands = 1 : i64, tpu.core_type = #tpu.core_type<tc>, window_params = [{pipeline_mode = #tpu.pipeline_mode<synchronous>, transform_indices = @transform_0, window_bounds = array<i64: 64, 128>}, {pipeline_mode = #tpu.pipeline_mode<synchronous>, transform_indices = @transform_1, window_bounds = array<i64: 32, 128>}, {pipeline_mode = #tpu.pipeline_mode<synchronous>, transform_indices = @transform_2, window_bounds = array<i64: 16, 32>}]} {
    %c0 = arith.constant 0 : index
    %0 = memref.load %arg1[%c0] : memref<16xi32, #tpu.memory_space<smem>>
    %1 = arith.index_cast %0 : i32 to index
    %c0_0 = arith.constant 0 : index
    %2 = vector.load %arg2[%1, %c0_0] : memref<64x128xf32, #tpu.memory_space<vmem>>, vector<1x128xf32>
    %c0_1 = arith.constant 0 : index
    %c0_2 = arith.constant 0 : index
    %3 = vector.load %arg5[%c0_1, %c0_2] : memref<16x128xf32, #tpu.memory_space<vmem>>, vector<1x128xf32>
    tpu.vector_store %arg5[%c0_1, %c0_2], %2 {strides = array<i32>} : memref<16x128xf32, #tpu.memory_space<vmem>>, vector<1x128xf32>,
    %c1 = arith.constant 1 : index
    %4 = memref.load %arg1[%c1] : memref<16xi32, #tpu.memory_space<smem>>
    %5 = arith.index_cast %4 : i32 to index
    %c0_3 = arith.constant 0 : index
    %6 = vector.load %arg2[%5, %c0_3] : memref<64x128xf32, #tpu.memory_space<vmem>>, vector<1x128xf32>
    %c1_4 = arith.constant 1 : index
    %c0_5 = arith.constant 0 : index
    %7 = vector.load %arg5[%c1_4, %c0_5] : memref<16x128xf32, #tpu.memory_space<vmem>>, vector<1x128xf32>
    tpu.vector_store %arg5[%c1_4, %c0_5], %6 {strides = array<i32>} : memref<16x128xf32, #tpu.memory_space<vmem>>, vector<1x128xf32>,
    %c2 = arith.constant 2 : index
    %8 = memref.load %arg1[%c2] : memref<16xi32, #tpu.memory_space<smem>>
    %9 = arith.index_cast %8 : i32 to index
    %c0_6 = arith.constant 0 : index
    %10 = vector.load %arg2[%9, %c0_6] : memref<64x128xf32, #tpu.memory_space<vmem>>, vector<1x128xf32>
    %c2_7 = arith.constant 2 : index
    %c0_8 = arith.constant 0 : index
    %11 = vector.load %arg5[%c2_7, %c0_8] : memref<16x128xf32, #tpu.memory_space<vmem>>, vector<1x128xf32>
    tpu.vector_store %arg5[%c2_7, %c0_8], %10 {strides = array<i32>} : memref<16x128xf32, #tpu.memory_space<vmem>>, vector<1x128xf32>,
    %c3 = arith.constant 3 : index
    %12 = memref.load %arg1[%c3] : memref<16xi32, #tpu.memory_space<smem>>
    %13 = arith.index_cast %12 : i32 to index
    %c0_9 = arith.constant 0 : index
    %14 = vector.load %arg2[%13, %c0_9] : memref<64x128xf32, #tpu.memory_space<vmem>>, vector<1x128xf32>
    %c3_10 = arith.constant 3 : index
    %c0_11 = arith.constant 0 : index
    %15 = vector.load %arg5[%c3_10, %c0_11] : memref<16x128xf32, #tpu.memory_space<vmem>>, vector<1x128xf32>
    tpu.vector_store %arg5[%c3_10, %c0_11], %14 {strides = array<i32>} : memref<16x128xf32, #tpu.memory_space<vmem>>, vector<1x128xf32>,
    %c4 = arith.constant 4 : index
    %16 = memref.load %arg1[%c4] : memref<16xi32, #tpu.memory_space<smem>>
    %17 = arith.index_cast %16 : i32 to index
    %c0_12 = arith.constant 0 : index
    %18 = vector.load %arg2[%17, %c0_12] : memref<64x128xf32, #tpu.memory_space<vmem>>, vector<1x128xf32>
    %c4_13 = arith.constant 4 : index
    %c0_14 = arith.constant 0 : index
    %19 = vector.load %arg5[%c4_13, %c0_14] : memref<16x128xf32, #tpu.memory_space<vmem>>, vector<1x128xf32>
    tpu.vector_store %arg5[%c4_13, %c0_14], %18 {strides = array<i32>} : memref<16x128xf32, #tpu.memory_space<vmem>>, vector<1x128xf32>,
    %c5 = arith.constant 5 : index
    %20 = memref.load %arg1[%c5] : memref<16xi32, #tpu.memory_space<smem>>
    %21 = arith.index_cast %20 : i32 to index
    %c0_15 = arith.constant 0 : index
    %22 = vector.load %arg2[%21, %c0_15] : memref<64x128xf32, #tpu.memory_space<vmem>>, vector<1x128xf32>
    %c5_16 = arith.constant 5 : index
    %c0_17 = arith.constant 0 : index
    %23 = vector.load %arg5[%c5_16, %c0_17] : memref<16x128xf32, #tpu.memory_space<vmem>>, vector<1x128xf32>
    tpu.vector_store %arg5[%c5_16, %c0_17], %22 {strides = array<i32>} : memref<16x128xf32, #tpu.memory_space<vmem>>, vector<1x128xf32>,
    %c6 = arith.constant 6 : index
    %24 = memref.load %arg1[%c6] : memref<16xi32, #tpu.memory_space<smem>>
    %25 = arith.index_cast %24 : i32 to index
    %c0_18 = arith.constant 0 : index
    %26 = vector.load %arg2[%25, %c0_18] : memref<64x128xf32, #tpu.memory_space<vmem>>, vector<1x128xf32>
    %c6_19 = arith.constant 6 : index
    %c0_20 = arith.constant 0 : index
    %27 = vector.load %arg5[%c6_19, %c0_20] : memref<16x128xf32, #tpu.memory_space<vmem>>, vector<1x128xf32>
    tpu.vector_store %arg5[%c6_19, %c0_20], %26 {strides = array<i32>} : memref<16x128xf32, #tpu.memory_space<vmem>>, vector<1x128xf32>,
    %c7 = arith.constant 7 : index
    %28 = memref.load %arg1[%c7] : memref<16xi32, #tpu.memory_space<smem>>
    %29 = arith.index_cast %28 : i32 to index
    %c0_21 = arith.constant 0 : index
    %30 = vector.load %arg2[%29, %c0_21] : memref<64x128xf32, #tpu.memory_space<vmem>>, vector<1x128xf32>
    %c7_22 = arith.constant 7 : index
    %c0_23 = arith.constant 0 : index
    %31 = vector.load %arg5[%c7_22, %c0_23] : memref<16x128xf32, #tpu.memory_space<vmem>>, vector<1x128xf32>
    tpu.vector_store %arg5[%c7_22, %c0_23], %30 {strides = array<i32>} : memref<16x128xf32, #tpu.memory_space<vmem>>, vector<1x128xf32>,
    %c8 = arith.constant 8 : index
    %32 = memref.load %arg1[%c8] : memref<16xi32, #tpu.memory_space<smem>>
    %33 = arith.index_cast %32 : i32 to index
    %c0_24 = arith.constant 0 : index
    %34 = vector.load %arg2[%33, %c0_24] : memref<64x128xf32, #tpu.memory_space<vmem>>, vector<1x128xf32>
    %c8_25 = arith.constant 8 : index
    %c0_26 = arith.constant 0 : index
    %35 = vector.load %arg5[%c8_25, %c0_26] : memref<16x128xf32, #tpu.memory_space<vmem>>, vector<1x128xf32>
    tpu.vector_store %arg5[%c8_25, %c0_26], %34 {strides = array<i32>} : memref<16x128xf32, #tpu.memory_space<vmem>>, vector<1x128xf32>,
    %c9 = arith.constant 9 : index
    %36 = memref.load %arg1[%c9] : memref<16xi32, #tpu.memory_space<smem>>
    %37 = arith.index_cast %36 : i32 to index
    %c0_27 = arith.constant 0 : index
    %38 = vector.load %arg2[%37, %c0_27] : memref<64x128xf32, #tpu.memory_space<vmem>>, vector<1x128xf32>
    %c9_28 = arith.constant 9 : index
    %c0_29 = arith.constant 0 : index
    %39 = vector.load %arg5[%c9_28, %c0_29] : memref<16x128xf32, #tpu.memory_space<vmem>>, vector<1x128xf32>
    tpu.vector_store %arg5[%c9_28, %c0_29], %38 {strides = array<i32>} : memref<16x128xf32, #tpu.memory_space<vmem>>, vector<1x128xf32>,
    %c10 = arith.constant 10 : index
    %40 = memref.load %arg1[%c10] : memref<16xi32, #tpu.memory_space<smem>>
    %41 = arith.index_cast %40 : i32 to index
    %c0_30 = arith.constant 0 : index
    %42 = vector.load %arg2[%41, %c0_30] : memref<64x128xf32, #tpu.memory_space<vmem>>, vector<1x128xf32>
    %c10_31 = arith.constant 10 : index
    %c0_32 = arith.constant 0 : index
    %43 = vector.load %arg5[%c10_31, %c0_32] : memref<16x128xf32, #tpu.memory_space<vmem>>, vector<1x128xf32>
    tpu.vector_store %arg5[%c10_31, %c0_32], %42 {strides = array<i32>} : memref<16x128xf32, #tpu.memory_space<vmem>>, vector<1x128xf32>,
    %c11 = arith.constant 11 : index
    %44 = memref.load %arg1[%c11] : memref<16xi32, #tpu.memory_space<smem>>
    %45 = arith.index_cast %44 : i32 to index
    %c0_33 = arith.constant 0 : index
    %46 = vector.load %arg2[%45, %c0_33] : memref<64x128xf32, #tpu.memory_space<vmem>>, vector<1x128xf32>
    %c11_34 = arith.constant 11 : index
    %c0_35 = arith.constant 0 : index
    %47 = vector.load %arg5[%c11_34, %c0_35] : memref<16x128xf32, #tpu.memory_space<vmem>>, vector<1x128xf32>
    tpu.vector_store %arg5[%c11_34, %c0_35], %46 {strides = array<i32>} : memref<16x128xf32, #tpu.memory_space<vmem>>, vector<1x128xf32>,
    %c12 = arith.constant 12 : index
    %48 = memref.load %arg1[%c12] : memref<16xi32, #tpu.memory_space<smem>>
    %49 = arith.index_cast %48 : i32 to index
    %c0_36 = arith.constant 0 : index
    %50 = vector.load %arg2[%49, %c0_36] : memref<64x128xf32, #tpu.memory_space<vmem>>, vector<1x128xf32>
    %c12_37 = arith.constant 12 : index
    %c0_38 = arith.constant 0 : index
    %51 = vector.load %arg5[%c12_37, %c0_38] : memref<16x128xf32, #tpu.memory_space<vmem>>, vector<1x128xf32>
    tpu.vector_store %arg5[%c12_37, %c0_38], %50 {strides = array<i32>} : memref<16x128xf32, #tpu.memory_space<vmem>>, vector<1x128xf32>,
    %c13 = arith.constant 13 : index
    %52 = memref.load %arg1[%c13] : memref<16xi32, #tpu.memory_space<smem>>
    %53 = arith.index_cast %52 : i32 to index
    %c0_39 = arith.constant 0 : index
    %54 = vector.load %arg2[%53, %c0_39] : memref<64x128xf32, #tpu.memory_space<vmem>>, vector<1x128xf32>
    %c13_40 = arith.constant 13 : index
    %c0_41 = arith.constant 0 : index
    %55 = vector.load %arg5[%c13_40, %c0_41] : memref<16x128xf32, #tpu.memory_space<vmem>>, vector<1x128xf32>
    tpu.vector_store %arg5[%c13_40, %c0_41], %54 {strides = array<i32>} : memref<16x128xf32, #tpu.memory_space<vmem>>, vector<1x128xf32>,
    %c14 = arith.constant 14 : index
    %56 = memref.load %arg1[%c14] : memref<16xi32, #tpu.memory_space<smem>>
    %57 = arith.index_cast %56 : i32 to index
    %c0_42 = arith.constant 0 : index
    %58 = vector.load %arg2[%57, %c0_42] : memref<64x128xf32, #tpu.memory_space<vmem>>, vector<1x128xf32>
    %c14_43 = arith.constant 14 : index
    %c0_44 = arith.constant 0 : index
    %59 = vector.load %arg5[%c14_43, %c0_44] : memref<16x128xf32, #tpu.memory_space<vmem>>, vector<1x128xf32>
    tpu.vector_store %arg5[%c14_43, %c0_44], %58 {strides = array<i32>} : memref<16x128xf32, #tpu.memory_space<vmem>>, vector<1x128xf32>,
    %c15 = arith.constant 15 : index
    %60 = memref.load %arg1[%c15] : memref<16xi32, #tpu.memory_space<smem>>
    %61 = arith.index_cast %60 : i32 to index
    %c0_45 = arith.constant 0 : index
    %62 = vector.load %arg2[%61, %c0_45] : memref<64x128xf32, #tpu.memory_space<vmem>>, vector<1x128xf32>
    %c15_46 = arith.constant 15 : index
    %c0_47 = arith.constant 0 : index
    %63 = vector.load %arg5[%c15_46, %c0_47] : memref<16x128xf32, #tpu.memory_space<vmem>>, vector<1x128xf32>
    tpu.vector_store %arg5[%c15_46, %c0_47], %62 {strides = array<i32>} : memref<16x128xf32, #tpu.memory_space<vmem>>, vector<1x128xf32>,
    %cst = arith.constant 0.000000e+00 : f32
    %64 = vector.broadcast %cst : f32 to vector<2x32xf32>
    %cst_48 = arith.constant 0.000000e+00 : f32
    %65 = vector.broadcast %cst_48 : f32 to vector<2x32xf32>
    %c0_49 = arith.constant 0 : index
    %c0_50 = arith.constant 0 : index
    %66 = vector.load %arg5[%c0_49, %c0_50] : memref<16x128xf32, #tpu.memory_space<vmem>>, vector<2x128xf32>
    %c0_51 = arith.constant 0 : index
    %c0_52 = arith.constant 0 : index
    %67 = vector.load %arg3[%c0_51, %c0_52] : memref<32x128xf32, #tpu.memory_space<vmem>>, vector<32x128xf32>
    %cst_53 = arith.constant dense<0.000000e+00> : vector<2x128xf32>
    %68 = tpu.matmul %64, %67, %cst_53 {dimension_numbers = #tpu.dot_dimension_numbers<[1], [0], [0], [1], [0, 0, 1, 1], [], []>} : vector<2x32xf32>, vector<32x128xf32>, vector<2x128xf32> -> vector<2x128xf32>
    %69 = arith.addf %66, %68 : vector<2x128xf32>
    %70 = vector.extract_strided_slice %69 {offsets = [0, 0], sizes = [2, 96], strides = [1, 1]} : vector<2x128xf32> to vector<2x96xf32>
    %71 = arith.negf %70 : vector<2x96xf32>
    %72 = math.exp %71 : vector<2x96xf32>
    %cst_54 = arith.constant 1.000000e+00 : f32
    %73 = vector.broadcast %cst_54 : f32 to vector<2x96xf32>
    %74 = arith.addf %73, %72 : vector<2x96xf32>
    %75 = arith.divf %73, %74 : vector<2x96xf32>
    %76 = vector.extract_strided_slice %69 {offsets = [0, 96], sizes = [2, 32], strides = [1, 1]} : vector<2x128xf32> to vector<2x32xf32>
    %77 = math.tanh %76 : vector<2x32xf32>
    %78 = vector.extract_strided_slice %75 {offsets = [0, 32], sizes = [2, 32], strides = [1, 1]} : vector<2x96xf32> to vector<2x32xf32>
    %79 = arith.mulf %78, %65 : vector<2x32xf32>
    %80 = vector.extract_strided_slice %75 {offsets = [0, 0], sizes = [2, 32], strides = [1, 1]} : vector<2x96xf32> to vector<2x32xf32>
    %81 = arith.mulf %80, %77 : vector<2x32xf32>
    %82 = arith.addf %79, %81 : vector<2x32xf32>
    %83 = vector.extract_strided_slice %75 {offsets = [0, 64], sizes = [2, 32], strides = [1, 1]} : vector<2x96xf32> to vector<2x32xf32>
    %84 = math.tanh %82 : vector<2x32xf32>
    %85 = arith.mulf %83, %84 : vector<2x32xf32>
    %86 = vector.extract_strided_slice %85 {offsets = [0, 0], sizes = [1, 32], strides = [1, 1]} : vector<2x32xf32> to vector<1x32xf32>
    %c0_55 = arith.constant 0 : index
    %c0_56 = arith.constant 0 : index
    %87 = vector.load %arg4[%c0_55, %c0_56] : memref<16x32xf32, #tpu.memory_space<vmem>>, vector<1x32xf32>
    tpu.vector_store %arg4[%c0_55, %c0_56], %86 {strides = array<i32>} : memref<16x32xf32, #tpu.memory_space<vmem>>, vector<1x32xf32>,
    %88 = vector.extract_strided_slice %85 {offsets = [1, 0], sizes = [1, 32], strides = [1, 1]} : vector<2x32xf32> to vector<1x32xf32>
    %c8_57 = arith.constant 8 : index
    %c0_58 = arith.constant 0 : index
    %89 = vector.load %arg4[%c8_57, %c0_58] : memref<16x32xf32, #tpu.memory_space<vmem>>, vector<1x32xf32>
    tpu.vector_store %arg4[%c8_57, %c0_58], %88 {strides = array<i32>} : memref<16x32xf32, #tpu.memory_space<vmem>>, vector<1x32xf32>,
    %c2_59 = arith.constant 2 : index
    %c0_60 = arith.constant 0 : index
    %90 = vector.load %arg5[%c2_59, %c0_60] : memref<16x128xf32, #tpu.memory_space<vmem>>, vector<2x128xf32>
    %c0_61 = arith.constant 0 : index
    %c0_62 = arith.constant 0 : index
    %91 = vector.load %arg3[%c0_61, %c0_62] : memref<32x128xf32, #tpu.memory_space<vmem>>, vector<32x128xf32>
    %cst_63 = arith.constant dense<0.000000e+00> : vector<2x128xf32>
    %92 = tpu.matmul %85, %91, %cst_63 {dimension_numbers = #tpu.dot_dimension_numbers<[1], [0], [0], [1], [0, 0, 1, 1], [], []>} : vector<2x32xf32>, vector<32x128xf32>, vector<2x128xf32> -> vector<2x128xf32>
    %93 = arith.addf %90, %92 : vector<2x128xf32>
    %94 = vector.extract_strided_slice %93 {offsets = [0, 0], sizes = [2, 96], strides = [1, 1]} : vector<2x128xf32> to vector<2x96xf32>
    %95 = arith.negf %94 : vector<2x96xf32>
    %96 = math.exp %95 : vector<2x96xf32>
    %cst_64 = arith.constant 1.000000e+00 : f32
    %97 = vector.broadcast %cst_64 : f32 to vector<2x96xf32>
    %98 = arith.addf %97, %96 : vector<2x96xf32>
    %99 = arith.divf %97, %98 : vector<2x96xf32>
    %100 = vector.extract_strided_slice %93 {offsets = [0, 96], sizes = [2, 32], strides = [1, 1]} : vector<2x128xf32> to vector<2x32xf32>
    %101 = math.tanh %100 : vector<2x32xf32>
    %102 = vector.extract_strided_slice %99 {offsets = [0, 32], sizes = [2, 32], strides = [1, 1]} : vector<2x96xf32> to vector<2x32xf32>
    %103 = arith.mulf %102, %82 : vector<2x32xf32>
    %104 = vector.extract_strided_slice %99 {offsets = [0, 0], sizes = [2, 32], strides = [1, 1]} : vector<2x96xf32> to vector<2x32xf32>
    %105 = arith.mulf %104, %101 : vector<2x32xf32>
    %106 = arith.addf %103, %105 : vector<2x32xf32>
    %107 = vector.extract_strided_slice %99 {offsets = [0, 64], sizes = [2, 32], strides = [1, 1]} : vector<2x96xf32> to vector<2x32xf32>
    %108 = math.tanh %106 : vector<2x32xf32>
    %109 = arith.mulf %107, %108 : vector<2x32xf32>
    %110 = vector.extract_strided_slice %109 {offsets = [0, 0], sizes = [1, 32], strides = [1, 1]} : vector<2x32xf32> to vector<1x32xf32>
    %c1_65 = arith.constant 1 : index
    %c0_66 = arith.constant 0 : index
    %111 = vector.load %arg4[%c1_65, %c0_66] : memref<16x32xf32, #tpu.memory_space<vmem>>, vector<1x32xf32>
    tpu.vector_store %arg4[%c1_65, %c0_66], %110 {strides = array<i32>} : memref<16x32xf32, #tpu.memory_space<vmem>>, vector<1x32xf32>,
    %112 = vector.extract_strided_slice %109 {offsets = [1, 0], sizes = [1, 32], strides = [1, 1]} : vector<2x32xf32> to vector<1x32xf32>
    %c9_67 = arith.constant 9 : index
    %c0_68 = arith.constant 0 : index
    %113 = vector.load %arg4[%c9_67, %c0_68] : memref<16x32xf32, #tpu.memory_space<vmem>>, vector<1x32xf32>
    tpu.vector_store %arg4[%c9_67, %c0_68], %112 {strides = array<i32>} : memref<16x32xf32, #tpu.memory_space<vmem>>, vector<1x32xf32>,
    %c4_69 = arith.constant 4 : index
    %c0_70 = arith.constant 0 : index
    %114 = vector.load %arg5[%c4_69, %c0_70] : memref<16x128xf32, #tpu.memory_space<vmem>>, vector<2x128xf32>
    %c0_71 = arith.constant 0 : index
    %c0_72 = arith.constant 0 : index
    %115 = vector.load %arg3[%c0_71, %c0_72] : memref<32x128xf32, #tpu.memory_space<vmem>>, vector<32x128xf32>
    %cst_73 = arith.constant dense<0.000000e+00> : vector<2x128xf32>
    %116 = tpu.matmul %109, %115, %cst_73 {dimension_numbers = #tpu.dot_dimension_numbers<[1], [0], [0], [1], [0, 0, 1, 1], [], []>} : vector<2x32xf32>, vector<32x128xf32>, vector<2x128xf32> -> vector<2x128xf32>
    %117 = arith.addf %114, %116 : vector<2x128xf32>
    %118 = vector.extract_strided_slice %117 {offsets = [0, 0], sizes = [2, 96], strides = [1, 1]} : vector<2x128xf32> to vector<2x96xf32>
    %119 = arith.negf %118 : vector<2x96xf32>
    %120 = math.exp %119 : vector<2x96xf32>
    %cst_74 = arith.constant 1.000000e+00 : f32
    %121 = vector.broadcast %cst_74 : f32 to vector<2x96xf32>
    %122 = arith.addf %121, %120 : vector<2x96xf32>
    %123 = arith.divf %121, %122 : vector<2x96xf32>
    %124 = vector.extract_strided_slice %117 {offsets = [0, 96], sizes = [2, 32], strides = [1, 1]} : vector<2x128xf32> to vector<2x32xf32>
    %125 = math.tanh %124 : vector<2x32xf32>
    %126 = vector.extract_strided_slice %123 {offsets = [0, 32], sizes = [2, 32], strides = [1, 1]} : vector<2x96xf32> to vector<2x32xf32>
    %127 = arith.mulf %126, %106 : vector<2x32xf32>
    %128 = vector.extract_strided_slice %123 {offsets = [0, 0], sizes = [2, 32], strides = [1, 1]} : vector<2x96xf32> to vector<2x32xf32>
    %129 = arith.mulf %128, %125 : vector<2x32xf32>
    %130 = arith.addf %127, %129 : vector<2x32xf32>
    %131 = vector.extract_strided_slice %123 {offsets = [0, 64], sizes = [2, 32], strides = [1, 1]} : vector<2x96xf32> to vector<2x32xf32>
    %132 = math.tanh %130 : vector<2x32xf32>
    %133 = arith.mulf %131, %132 : vector<2x32xf32>
    %134 = vector.extract_strided_slice %133 {offsets = [0, 0], sizes = [1, 32], strides = [1, 1]} : vector<2x32xf32> to vector<1x32xf32>
    %c2_75 = arith.constant 2 : index
    %c0_76 = arith.constant 0 : index
    %135 = vector.load %arg4[%c2_75, %c0_76] : memref<16x32xf32, #tpu.memory_space<vmem>>, vector<1x32xf32>
    tpu.vector_store %arg4[%c2_75, %c0_76], %134 {strides = array<i32>} : memref<16x32xf32, #tpu.memory_space<vmem>>, vector<1x32xf32>,
    %136 = vector.extract_strided_slice %133 {offsets = [1, 0], sizes = [1, 32], strides = [1, 1]} : vector<2x32xf32> to vector<1x32xf32>
    %c10_77 = arith.constant 10 : index
    %c0_78 = arith.constant 0 : index
    %137 = vector.load %arg4[%c10_77, %c0_78] : memref<16x32xf32, #tpu.memory_space<vmem>>, vector<1x32xf32>
    tpu.vector_store %arg4[%c10_77, %c0_78], %136 {strides = array<i32>} : memref<16x32xf32, #tpu.memory_space<vmem>>, vector<1x32xf32>,
    %c6_79 = arith.constant 6 : index
    %c0_80 = arith.constant 0 : index
    %138 = vector.load %arg5[%c6_79, %c0_80] : memref<16x128xf32, #tpu.memory_space<vmem>>, vector<2x128xf32>
    %c0_81 = arith.constant 0 : index
    %c0_82 = arith.constant 0 : index
    %139 = vector.load %arg3[%c0_81, %c0_82] : memref<32x128xf32, #tpu.memory_space<vmem>>, vector<32x128xf32>
    %cst_83 = arith.constant dense<0.000000e+00> : vector<2x128xf32>
    %140 = tpu.matmul %133, %139, %cst_83 {dimension_numbers = #tpu.dot_dimension_numbers<[1], [0], [0], [1], [0, 0, 1, 1], [], []>} : vector<2x32xf32>, vector<32x128xf32>, vector<2x128xf32> -> vector<2x128xf32>
    %141 = arith.addf %138, %140 : vector<2x128xf32>
    %142 = vector.extract_strided_slice %141 {offsets = [0, 0], sizes = [2, 96], strides = [1, 1]} : vector<2x128xf32> to vector<2x96xf32>
    %143 = arith.negf %142 : vector<2x96xf32>
    %144 = math.exp %143 : vector<2x96xf32>
    %cst_84 = arith.constant 1.000000e+00 : f32
    %145 = vector.broadcast %cst_84 : f32 to vector<2x96xf32>
    %146 = arith.addf %145, %144 : vector<2x96xf32>
    %147 = arith.divf %145, %146 : vector<2x96xf32>
    %148 = vector.extract_strided_slice %141 {offsets = [0, 96], sizes = [2, 32], strides = [1, 1]} : vector<2x128xf32> to vector<2x32xf32>
    %149 = math.tanh %148 : vector<2x32xf32>
    %150 = vector.extract_strided_slice %147 {offsets = [0, 32], sizes = [2, 32], strides = [1, 1]} : vector<2x96xf32> to vector<2x32xf32>
    %151 = arith.mulf %150, %130 : vector<2x32xf32>
    %152 = vector.extract_strided_slice %147 {offsets = [0, 0], sizes = [2, 32], strides = [1, 1]} : vector<2x96xf32> to vector<2x32xf32>
    %153 = arith.mulf %152, %149 : vector<2x32xf32>
    %154 = arith.addf %151, %153 : vector<2x32xf32>
    %155 = vector.extract_strided_slice %147 {offsets = [0, 64], sizes = [2, 32], strides = [1, 1]} : vector<2x96xf32> to vector<2x32xf32>
    %156 = math.tanh %154 : vector<2x32xf32>
    %157 = arith.mulf %155, %156 : vector<2x32xf32>
    %158 = vector.extract_strided_slice %157 {offsets = [0, 0], sizes = [1, 32], strides = [1, 1]} : vector<2x32xf32> to vector<1x32xf32>
    %c3_85 = arith.constant 3 : index
    %c0_86 = arith.constant 0 : index
    %159 = vector.load %arg4[%c3_85, %c0_86] : memref<16x32xf32, #tpu.memory_space<vmem>>, vector<1x32xf32>
    tpu.vector_store %arg4[%c3_85, %c0_86], %158 {strides = array<i32>} : memref<16x32xf32, #tpu.memory_space<vmem>>, vector<1x32xf32>,
    %160 = vector.extract_strided_slice %157 {offsets = [1, 0], sizes = [1, 32], strides = [1, 1]} : vector<2x32xf32> to vector<1x32xf32>
    %c11_87 = arith.constant 11 : index
    %c0_88 = arith.constant 0 : index
    %161 = vector.load %arg4[%c11_87, %c0_88] : memref<16x32xf32, #tpu.memory_space<vmem>>, vector<1x32xf32>
    tpu.vector_store %arg4[%c11_87, %c0_88], %160 {strides = array<i32>} : memref<16x32xf32, #tpu.memory_space<vmem>>, vector<1x32xf32>,
    %c8_89 = arith.constant 8 : index
    %c0_90 = arith.constant 0 : index
    %162 = vector.load %arg5[%c8_89, %c0_90] : memref<16x128xf32, #tpu.memory_space<vmem>>, vector<2x128xf32>
    %c0_91 = arith.constant 0 : index
    %c0_92 = arith.constant 0 : index
    %163 = vector.load %arg3[%c0_91, %c0_92] : memref<32x128xf32, #tpu.memory_space<vmem>>, vector<32x128xf32>
    %cst_93 = arith.constant dense<0.000000e+00> : vector<2x128xf32>
    %164 = tpu.matmul %157, %163, %cst_93 {dimension_numbers = #tpu.dot_dimension_numbers<[1], [0], [0], [1], [0, 0, 1, 1], [], []>} : vector<2x32xf32>, vector<32x128xf32>, vector<2x128xf32> -> vector<2x128xf32>
    %165 = arith.addf %162, %164 : vector<2x128xf32>
    %166 = vector.extract_strided_slice %165 {offsets = [0, 0], sizes = [2, 96], strides = [1, 1]} : vector<2x128xf32> to vector<2x96xf32>
    %167 = arith.negf %166 : vector<2x96xf32>
    %168 = math.exp %167 : vector<2x96xf32>
    %cst_94 = arith.constant 1.000000e+00 : f32
    %169 = vector.broadcast %cst_94 : f32 to vector<2x96xf32>
    %170 = arith.addf %169, %168 : vector<2x96xf32>
    %171 = arith.divf %169, %170 : vector<2x96xf32>
    %172 = vector.extract_strided_slice %165 {offsets = [0, 96], sizes = [2, 32], strides = [1, 1]} : vector<2x128xf32> to vector<2x32xf32>
    %173 = math.tanh %172 : vector<2x32xf32>
    %174 = vector.extract_strided_slice %171 {offsets = [0, 32], sizes = [2, 32], strides = [1, 1]} : vector<2x96xf32> to vector<2x32xf32>
    %175 = arith.mulf %174, %154 : vector<2x32xf32>
    %176 = vector.extract_strided_slice %171 {offsets = [0, 0], sizes = [2, 32], strides = [1, 1]} : vector<2x96xf32> to vector<2x32xf32>
    %177 = arith.mulf %176, %173 : vector<2x32xf32>
    %178 = arith.addf %175, %177 : vector<2x32xf32>
    %179 = vector.extract_strided_slice %171 {offsets = [0, 64], sizes = [2, 32], strides = [1, 1]} : vector<2x96xf32> to vector<2x32xf32>
    %180 = math.tanh %178 : vector<2x32xf32>
    %181 = arith.mulf %179, %180 : vector<2x32xf32>
    %182 = vector.extract_strided_slice %181 {offsets = [0, 0], sizes = [1, 32], strides = [1, 1]} : vector<2x32xf32> to vector<1x32xf32>
    %c4_95 = arith.constant 4 : index
    %c0_96 = arith.constant 0 : index
    %183 = vector.load %arg4[%c4_95, %c0_96] : memref<16x32xf32, #tpu.memory_space<vmem>>, vector<1x32xf32>
    tpu.vector_store %arg4[%c4_95, %c0_96], %182 {strides = array<i32>} : memref<16x32xf32, #tpu.memory_space<vmem>>, vector<1x32xf32>,
    %184 = vector.extract_strided_slice %181 {offsets = [1, 0], sizes = [1, 32], strides = [1, 1]} : vector<2x32xf32> to vector<1x32xf32>
    %c12_97 = arith.constant 12 : index
    %c0_98 = arith.constant 0 : index
    %185 = vector.load %arg4[%c12_97, %c0_98] : memref<16x32xf32, #tpu.memory_space<vmem>>, vector<1x32xf32>
    tpu.vector_store %arg4[%c12_97, %c0_98], %184 {strides = array<i32>} : memref<16x32xf32, #tpu.memory_space<vmem>>, vector<1x32xf32>,
    %c10_99 = arith.constant 10 : index
    %c0_100 = arith.constant 0 : index
    %186 = vector.load %arg5[%c10_99, %c0_100] : memref<16x128xf32, #tpu.memory_space<vmem>>, vector<2x128xf32>
    %c0_101 = arith.constant 0 : index
    %c0_102 = arith.constant 0 : index
    %187 = vector.load %arg3[%c0_101, %c0_102] : memref<32x128xf32, #tpu.memory_space<vmem>>, vector<32x128xf32>
    %cst_103 = arith.constant dense<0.000000e+00> : vector<2x128xf32>
    %188 = tpu.matmul %181, %187, %cst_103 {dimension_numbers = #tpu.dot_dimension_numbers<[1], [0], [0], [1], [0, 0, 1, 1], [], []>} : vector<2x32xf32>, vector<32x128xf32>, vector<2x128xf32> -> vector<2x128xf32>
    %189 = arith.addf %186, %188 : vector<2x128xf32>
    %190 = vector.extract_strided_slice %189 {offsets = [0, 0], sizes = [2, 96], strides = [1, 1]} : vector<2x128xf32> to vector<2x96xf32>
    %191 = arith.negf %190 : vector<2x96xf32>
    %192 = math.exp %191 : vector<2x96xf32>
    %cst_104 = arith.constant 1.000000e+00 : f32
    %193 = vector.broadcast %cst_104 : f32 to vector<2x96xf32>
    %194 = arith.addf %193, %192 : vector<2x96xf32>
    %195 = arith.divf %193, %194 : vector<2x96xf32>
    %196 = vector.extract_strided_slice %189 {offsets = [0, 96], sizes = [2, 32], strides = [1, 1]} : vector<2x128xf32> to vector<2x32xf32>
    %197 = math.tanh %196 : vector<2x32xf32>
    %198 = vector.extract_strided_slice %195 {offsets = [0, 32], sizes = [2, 32], strides = [1, 1]} : vector<2x96xf32> to vector<2x32xf32>
    %199 = arith.mulf %198, %178 : vector<2x32xf32>
    %200 = vector.extract_strided_slice %195 {offsets = [0, 0], sizes = [2, 32], strides = [1, 1]} : vector<2x96xf32> to vector<2x32xf32>
    %201 = arith.mulf %200, %197 : vector<2x32xf32>
    %202 = arith.addf %199, %201 : vector<2x32xf32>
    %203 = vector.extract_strided_slice %195 {offsets = [0, 64], sizes = [2, 32], strides = [1, 1]} : vector<2x96xf32> to vector<2x32xf32>
    %204 = math.tanh %202 : vector<2x32xf32>
    %205 = arith.mulf %203, %204 : vector<2x32xf32>
    %206 = vector.extract_strided_slice %205 {offsets = [0, 0], sizes = [1, 32], strides = [1, 1]} : vector<2x32xf32> to vector<1x32xf32>
    %c5_105 = arith.constant 5 : index
    %c0_106 = arith.constant 0 : index
    %207 = vector.load %arg4[%c5_105, %c0_106] : memref<16x32xf32, #tpu.memory_space<vmem>>, vector<1x32xf32>
    tpu.vector_store %arg4[%c5_105, %c0_106], %206 {strides = array<i32>} : memref<16x32xf32, #tpu.memory_space<vmem>>, vector<1x32xf32>,
    %208 = vector.extract_strided_slice %205 {offsets = [1, 0], sizes = [1, 32], strides = [1, 1]} : vector<2x32xf32> to vector<1x32xf32>
    %c13_107 = arith.constant 13 : index
    %c0_108 = arith.constant 0 : index
    %209 = vector.load %arg4[%c13_107, %c0_108] : memref<16x32xf32, #tpu.memory_space<vmem>>, vector<1x32xf32>
    tpu.vector_store %arg4[%c13_107, %c0_108], %208 {strides = array<i32>} : memref<16x32xf32, #tpu.memory_space<vmem>>, vector<1x32xf32>,
    %c12_109 = arith.constant 12 : index
    %c0_110 = arith.constant 0 : index
    %210 = vector.load %arg5[%c12_109, %c0_110] : memref<16x128xf32, #tpu.memory_space<vmem>>, vector<2x128xf32>
    %c0_111 = arith.constant 0 : index
    %c0_112 = arith.constant 0 : index
    %211 = vector.load %arg3[%c0_111, %c0_112] : memref<32x128xf32, #tpu.memory_space<vmem>>, vector<32x128xf32>
    %cst_113 = arith.constant dense<0.000000e+00> : vector<2x128xf32>
    %212 = tpu.matmul %205, %211, %cst_113 {dimension_numbers = #tpu.dot_dimension_numbers<[1], [0], [0], [1], [0, 0, 1, 1], [], []>} : vector<2x32xf32>, vector<32x128xf32>, vector<2x128xf32> -> vector<2x128xf32>
    %213 = arith.addf %210, %212 : vector<2x128xf32>
    %214 = vector.extract_strided_slice %213 {offsets = [0, 0], sizes = [2, 96], strides = [1, 1]} : vector<2x128xf32> to vector<2x96xf32>
    %215 = arith.negf %214 : vector<2x96xf32>
    %216 = math.exp %215 : vector<2x96xf32>
    %cst_114 = arith.constant 1.000000e+00 : f32
    %217 = vector.broadcast %cst_114 : f32 to vector<2x96xf32>
    %218 = arith.addf %217, %216 : vector<2x96xf32>
    %219 = arith.divf %217, %218 : vector<2x96xf32>
    %220 = vector.extract_strided_slice %213 {offsets = [0, 96], sizes = [2, 32], strides = [1, 1]} : vector<2x128xf32> to vector<2x32xf32>
    %221 = math.tanh %220 : vector<2x32xf32>
    %222 = vector.extract_strided_slice %219 {offsets = [0, 32], sizes = [2, 32], strides = [1, 1]} : vector<2x96xf32> to vector<2x32xf32>
    %223 = arith.mulf %222, %202 : vector<2x32xf32>
    %224 = vector.extract_strided_slice %219 {offsets = [0, 0], sizes = [2, 32], strides = [1, 1]} : vector<2x96xf32> to vector<2x32xf32>
    %225 = arith.mulf %224, %221 : vector<2x32xf32>
    %226 = arith.addf %223, %225 : vector<2x32xf32>
    %227 = vector.extract_strided_slice %219 {offsets = [0, 64], sizes = [2, 32], strides = [1, 1]} : vector<2x96xf32> to vector<2x32xf32>
    %228 = math.tanh %226 : vector<2x32xf32>
    %229 = arith.mulf %227, %228 : vector<2x32xf32>
    %230 = vector.extract_strided_slice %229 {offsets = [0, 0], sizes = [1, 32], strides = [1, 1]} : vector<2x32xf32> to vector<1x32xf32>
    %c6_115 = arith.constant 6 : index
    %c0_116 = arith.constant 0 : index
    %231 = vector.load %arg4[%c6_115, %c0_116] : memref<16x32xf32, #tpu.memory_space<vmem>>, vector<1x32xf32>
    tpu.vector_store %arg4[%c6_115, %c0_116], %230 {strides = array<i32>} : memref<16x32xf32, #tpu.memory_space<vmem>>, vector<1x32xf32>,
    %232 = vector.extract_strided_slice %229 {offsets = [1, 0], sizes = [1, 32], strides = [1, 1]} : vector<2x32xf32> to vector<1x32xf32>
    %c14_117 = arith.constant 14 : index
    %c0_118 = arith.constant 0 : index
    %233 = vector.load %arg4[%c14_117, %c0_118] : memref<16x32xf32, #tpu.memory_space<vmem>>, vector<1x32xf32>
    tpu.vector_store %arg4[%c14_117, %c0_118], %232 {strides = array<i32>} : memref<16x32xf32, #tpu.memory_space<vmem>>, vector<1x32xf32>,
    %c14_119 = arith.constant 14 : index
    %c0_120 = arith.constant 0 : index
    %234 = vector.load %arg5[%c14_119, %c0_120] : memref<16x128xf32, #tpu.memory_space<vmem>>, vector<2x128xf32>
    %c0_121 = arith.constant 0 : index
    %c0_122 = arith.constant 0 : index
    %235 = vector.load %arg3[%c0_121, %c0_122] : memref<32x128xf32, #tpu.memory_space<vmem>>, vector<32x128xf32>
    %cst_123 = arith.constant dense<0.000000e+00> : vector<2x128xf32>
    %236 = tpu.matmul %229, %235, %cst_123 {dimension_numbers = #tpu.dot_dimension_numbers<[1], [0], [0], [1], [0, 0, 1, 1], [], []>} : vector<2x32xf32>, vector<32x128xf32>, vector<2x128xf32> -> vector<2x128xf32>
    %237 = arith.addf %234, %236 : vector<2x128xf32>
    %238 = vector.extract_strided_slice %237 {offsets = [0, 0], sizes = [2, 96], strides = [1, 1]} : vector<2x128xf32> to vector<2x96xf32>
    %239 = arith.negf %238 : vector<2x96xf32>
    %240 = math.exp %239 : vector<2x96xf32>
    %cst_124 = arith.constant 1.000000e+00 : f32
    %241 = vector.broadcast %cst_124 : f32 to vector<2x96xf32>
    %242 = arith.addf %241, %240 : vector<2x96xf32>
    %243 = arith.divf %241, %242 : vector<2x96xf32>
    %244 = vector.extract_strided_slice %237 {offsets = [0, 96], sizes = [2, 32], strides = [1, 1]} : vector<2x128xf32> to vector<2x32xf32>
    %245 = math.tanh %244 : vector<2x32xf32>
    %246 = vector.extract_strided_slice %243 {offsets = [0, 32], sizes = [2, 32], strides = [1, 1]} : vector<2x96xf32> to vector<2x32xf32>
    %247 = arith.mulf %246, %226 : vector<2x32xf32>
    %248 = vector.extract_strided_slice %243 {offsets = [0, 0], sizes = [2, 32], strides = [1, 1]} : vector<2x96xf32> to vector<2x32xf32>
    %249 = arith.mulf %248, %245 : vector<2x32xf32>
    %250 = arith.addf %247, %249 : vector<2x32xf32>
    %251 = vector.extract_strided_slice %243 {offsets = [0, 64], sizes = [2, 32], strides = [1, 1]} : vector<2x96xf32> to vector<2x32xf32>
    %252 = math.tanh %250 : vector<2x32xf32>
    %253 = arith.mulf %251, %252 : vector<2x32xf32>
    %254 = vector.extract_strided_slice %253 {offsets = [0, 0], sizes = [1, 32], strides = [1, 1]} : vector<2x32xf32> to vector<1x32xf32>
    %c7_125 = arith.constant 7 : index
    %c0_126 = arith.constant 0 : index
    %255 = vector.load %arg4[%c7_125, %c0_126] : memref<16x32xf32, #tpu.memory_space<vmem>>, vector<1x32xf32>
    tpu.vector_store %arg4[%c7_125, %c0_126], %254 {strides = array<i32>} : memref<16x32xf32, #tpu.memory_space<vmem>>, vector<1x32xf32>,
    %256 = vector.extract_strided_slice %253 {offsets = [1, 0], sizes = [1, 32], strides = [1, 1]} : vector<2x32xf32> to vector<1x32xf32>
    %c15_127 = arith.constant 15 : index
    %c0_128 = arith.constant 0 : index
    %257 = vector.load %arg4[%c15_127, %c0_128] : memref<16x32xf32, #tpu.memory_space<vmem>>, vector<1x32xf32>
    tpu.vector_store %arg4[%c15_127, %c0_128], %256 {strides = array<i32>} : memref<16x32xf32, #tpu.memory_space<vmem>>, vector<1x32xf32>,
    return
  }
  func.func @transform_0(%arg0: i32, %arg1: memref<16xi32, #tpu.memory_space<smem>>) -> (i32, i32) {
    %c0_i32 = arith.constant 0 : i32
    %c0_i32_0 = arith.constant 0 : i32
    %c0_i32_1 = arith.constant 0 : i32
    return %c0_i32, %c0_i32_0 : i32, i32
  }
  func.func @transform_1(%arg0: i32, %arg1: memref<16xi32, #tpu.memory_space<smem>>) -> (i32, i32) {
    %c0_i32 = arith.constant 0 : i32
    %c0_i32_0 = arith.constant 0 : i32
    %c0_i32_1 = arith.constant 0 : i32
    return %c0_i32, %c0_i32_0 : i32, i32
  }
  func.func @transform_2(%arg0: i32, %arg1: memref<16xi32, #tpu.memory_space<smem>>) -> (i32, i32) {
    %c0_i32 = arith.constant 0 : i32
    %c0_i32_0 = arith.constant 0 : i32
    %c0_i32_1 = arith.constant 0 : i32
    return %c0_i32, %c0_i32_0 : i32, i32
  }
}

</mosaic_0001>

<bundles_post_ra>
// kernel: lstm_module_forward.3
= control target key start
LH: loop header
LB: loop body
LE: loop exit
PB: predicated region body
PF: predicated region fallthrough
CT: control target
= control target key end

     0   :  { %v111_v0 = vmov 0.0   ;;  %vm112_vm0 = vmmov 0   ;;  %vm41_vm1 = vcmask 261120   ;;  %s154_s1 = inlined_call_operand.vmem [shape: bf16[32,128], index: 1, kind: input, shape index: {}]   ;;  %s155_s0 = inlined_call_operand.vmem [shape: f32[16,32], index: 0, kind: input, shape index: {}]   ;;  %s156_s2 = inlined_call_operand.vmem [shape: f32[1,128], index: 2, kind: input, shape index: {}]   ;;  %s157_s3 = inlined_call_operand.vmem [shape: f32[16,128], index: 3, kind: output, shape index: {}]  }
   0x1   :  { %99 = vmatprep.subr.bf16.mxu0 %v111_v0  ;;  %v109_v1 = vld [vmem:[%s154_s1] sm:$0xff]   ;;  %103 = vmatprep.mubr.msk.bf16.mxu0 %vm112_vm0, %v111_v0  ;;  %v110_v2 = vld [vmem:[%s154_s1 + $0x8] sm:$0xff]  }
   0x2   :  { %100 = vmatpush3.bf16.msra.mxu0 %v109_v1  ;;  %v15_v3 = vld [vmem:[%s155_s0] sm:$0xff]  ;;  %v16_v4 = vld [vmem:[%s155_s0 + $0x8] sm:$0xff] }
   0x3   :  { %101 = vmatprep.subr.bf16.mxu0 %v111_v0  ;;  %v17_v5 = vpack.c.bf16 %v16_v4, %v15_v3  ;;  %v92_v6 = vld [vmem:[%s156_s2] ss:$0 sm:$0xff] }
   0x6   :  { %102 = vmatpush3.bf16.msra.mxu0 %v110_v2 }
   0x9   :  { %104 = vmatmul.mubr.msk.bf16.vlgmr.msra.gmra.mrb[0].mxu0 %vm41_vm1, %v17_v5 }
  0xdc   :  { %v79_v7 = vpop.f32.mrb[0].mxu0 }
  0xdd   :  { %v80_v8 = vadd.f32 %v92_v6, %v79_v7  ;;  %v105_v9 = vpop.f32.mrb[1].mxu0 }
  0xde   :  { %v82_v10 = vpop.f32.mrb[2].mxu0 }
  0xdf   :  { %86 = vst [vmem:[%s157_s3] sm:$0xff] %v80_v8  ;;  %v83_v11 = vadd.f32 %v92_v6, %v82_v10  ;;  %v106_v12 = vpop.f32.mrb[3].mxu0 }
  0xe1   :  { %87 = vst [vmem:[%s157_s3 + $0x8] sm:$0xff] %v83_v11 }

// kernel: lstm_module_forward.2
= control target key start
LH: loop header
LB: loop body
LE: loop exit
PB: predicated region body
PF: predicated region fallthrough
CT: control target
= control target key end

     0   :  { %s1514_s0 = inlined_call_operand.vmem [shape: s32[16], index: 0, kind: input, shape index: {}]   ;;  %s1515_s1 = inlined_call_operand.hbm [shape: f32[64,128], index: 1, kind: input, shape index: {}]   ;;  %s1516_s2 = inlined_call_operand.vmem [shape: f32[32,128], index: 2, kind: input, shape index: {}]   ;;  %s1517_s3 = inlined_call_operand.vmem [shape: f32[16,32], index: 3, kind: output, shape index: {}]  }
   0x1   :  { %s8_s14 = sshll.u32 %s1514_s0, 4  ;;  %s9_s14 = int_to_ptr.vmem [resolvable:$true] %s8_s14 }
   0x2   :  { %s1264_s15 = scalar_lea.vmem %s9_s14, 16  ;;  %p1269_p1 = scmp.lt.s32.totalorder %s9_s14, %s9_s14 }
   0x3   :  { %p1265_p0 = scmp.ne.s32.totalorder %s9_s14, %s1264_s15  ;;  %p1270_p2 = scmp.lt.s32.totalorder %s1264_s15, %s1264_s15 }
   0x5   :  { %p1271_p3 = por %p1270_p2, %p1269_p1 }
   0x7   :  { %p1272_p4 = pnand %p1271_p3, %p1265_p0 }
   0x9   :  { %1275 = shalt.err (!%p1272_p4)  }
   0xa   :  { %s1302_s16 = smov [#allocation4]  }
   0xb   :  { %11 = dma.vmem_to_smem %s9_s14, 16, %s1302_s16, [#allocation3] }
   0xc   :  { %1298 = dma.done.wait [#allocation3], 16 }
   0xd   :  { %1299 = vsyncadd [#allocation3], 4294967280 }
   0xe   :  { %13 = sfence }
   0xf   :  { %14 = vsyncpa [#allocation6], 0  ;;  %s1303_s17 = smov [#allocation5]   ;;  %s1276_s0 = scalar_lea.hbm %s1515_s1, 1024 }
  0x10   :  { %s20_s18 = sshll.u32 %s1303_s17, 4  ;;  %p1277_p5 = scmp.ne.s32.totalorder %s1515_s1, %s1276_s0  ;;  %s21_s18 = int_to_ptr.vmem [resolvable:$true] %s20_s18 }
  0x11   :  { %p1280_p6 = scmp.lt.u32.totalorder %s1276_s0, %s1515_s1 }
  0x13   :  { %p1282_p7 = pnand %p1280_p6, %p1277_p5 }
  0x15   :  { %1285 = shalt.err (!%p1282_p7)
}
  0x16   :  { %s1286_s25 = scalar_lea.vmem %s21_s18, 1024  ;;  %p1291_p9 = scmp.lt.s32.totalorder %s21_s18, %s21_s18 }
  0x17   :  { %p1287_p8 = scmp.ne.s32.totalorder %s21_s18, %s1286_s25  ;;  %p1292_p10 = scmp.lt.s32.totalorder %s1286_s25, %s1286_s25 }
  0x19   :  { %p1293_p11 = por %p1292_p10, %p1291_p9 }
  0x1b   :  { %p1294_p12 = pnand %p1293_p11, %p1287_p8 }
  0x1d   :  { %1297 = shalt.err (!%p1294_p12)
}
  0x1e   :  { %s1304_s26 = smov 128   ;;  %s1305_s27 = smov 8  }
  0x1f   :  { %26 = dma.hbm_to_vmem [thread:$0]  %s1515_s1, 1024, %s21_s18, [#allocation6], %s1304_s26, %s1304_s26, %s1305_s27  }
  0x20   :  { %1300 = dma.done.wait [#allocation6], 1024  }
  0x21   :  { %1301 = vsyncadd [#allocation6], 4294966272  ;;  %v1306_v0 = vmov 0.0|0.0   ;;  %vm1307_vm0 = vmmov 0   ;;  %v1308_v1 = vmov 0.0   ;;  %s32_s30 = sld [smem:[#allocation4]] }
  0x22   :  { %1143 = vmatprep.subr.bf16.mxu0 %v1306_v0  ;;  %1063 = vmatprep.mubr.msk.f32.mxu0 %vm1307_vm0, %v1308_v1  ;;  %s985_s4 = sld [smem:[#allocation4 + $0x1]]  ;;  %v97_v2 = vld [vmem:[%s1516_s2] sm:$0xff]  ;;  %v98_v3 = vld [vmem:[%s1516_s2 + $0x8] sm:$0xff]  ;;  %v99_v4 = vld [vmem:[%s1516_s2 + $0x10] sm:$0xff]  ;;  %s986_s14 = sld [smem:[#allocation4 + $0x2]]  ;;  %vm204_vm1 = vcmask 253952  }
  0x23   :  { %1149 = vmatprep.subr.bf16.mxu1 %v1306_v0  ;;  %1074 = vmatprep.mubr.msk.f32.mxu1 %vm1307_vm0, %v1308_v1  ;;  %v1361_v5 = vpack.c.bf16 %v98_v3, %v97_v2  ;;  %v100_v6 = vld [vmem:[%s1516_s2 + $0x18] sm:$0xff]  ;;  %s1309_s2 = smov 32   ;;  %s987_s15 = sld [smem:[#allocation4 + $0x3]]  ;;  %vm206_vm2 = vcmask 254977   ;;  %vm101_vm3 = vcmask 261120  }
  0x24   :  { %v1367_v9 = vpack.c.bf16 %v100_v6, %v99_v4  ;;  %s1310_s18 = smov 64   ;;  %s988_s22 = sld [smem:[#allocation4 + $0x4]] }
  0x25   :  { %1145 = vmatpush3.bf16.msra.mxu0 %v1361_v5  ;;  %1151 = vmatpush3.bf16.msra.mxu1 %v1361_v5  ;;  %s989_s23 = sld [smem:[#allocation4 + $0x5]]  ;;  %s992_s10 = sld [smem:[#allocation4 + $0x8]] }
  0x26   :  { %1146 = vmatprep.subr.bf16.mxu0 %v1306_v0  ;;  %1152 = vmatprep.subr.bf16.mxu1 %v1306_v0  ;;  %s993_s11 = sld [smem:[#allocation4 + $0x9]]  ;;  %s994_s19 = sld [smem:[#allocation4 + $0xa]] }
  0x27   :  { %s33_s12 = scalar_lea.vmem [#allocation5], %s32_s30  ;;  %s990_s30 = sld [smem:[#allocation4 + $0x6]] }
  0x28   :  { %v34_v7 = vld [vmem:[%s33_s12] sm:$0x1]  ;;  %s37_s13 = scalar_lea.vmem [#allocation5], %s985_s4  ;;  %s41_s16 = scalar_lea.vmem [#allocation5], %s986_s14 }
  0x29   :  { %v38_v8 = vld [vmem:[%s37_s13] sm:$0x1]  ;;  %35 = vst [vmem:[#allocation2] sm:$0x1] %v34_v7  ;;  %1148 = vmatpush3.bf16.msra.mxu0 %v1367_v9  ;;  %1154 = vmatpush3.bf16.msra.mxu1 %v1367_v9  ;;  %s45_s17 = scalar_lea.vmem [#allocation5], %s987_s15  ;;  %s991_s4 = sld [smem:[#allocation4 + $0x7]] }
  0x2a   :  { %39 = vst [vmem:[#allocation2 + $0x1] sm:$0x1] %v38_v8  ;;  %1155 = vmatprep.subr.bf16.mxu0 %v1306_v0  ;;  %1161 = vmatprep.subr.bf16.mxu1 %v1306_v0  ;;  %v42_v25 = vld [vmem:[%s41_s16] sm:$0x1]  ;;  %s49_s24 = scalar_lea.vmem [#allocation5], %s988_s22  ;;  %s995_s20 = sld [smem:[#allocation4 + $0xb]] }
  0x2b   :  { %v46_v26 = vld [vmem:[%s45_s17] sm:$0x1]  ;;  %43 = vst [vmem:[#allocation2 + $0x2] sm:$0x1] %v42_v25  ;;  %s53_s25 = scalar_lea.vmem [#allocation5], %s989_s23  ;;  %s65_s12 = scalar_lea.vmem [#allocation5], %s992_s10 }
  0x2c   :  { %1064 = vmatmul.mubr.f32.vlgmr.msra.gmra.mrb[0].mxu0 %v1308_v1  ;;  %47 = vst [vmem:[#allocation2 + $0x3] sm:$0x1] %v46_v26  ;;  %v50_v45 = vld [vmem:[%s49_s24] sm:$0x1]  ;;  %s69_s13 = scalar_lea.vmem [#allocation5], %s993_s11  ;;  %s73_s0 = scalar_lea.vmem [#allocation5], %s994_s19 }
  0x2d   :  { %1157 = vmatpush3.bf16.msra.mxu0 %v1361_v5  ;;  %1085 = vmatprep.mubr.msk.f32.mxu0 %vm1307_vm0, %v1308_v1  ;;  %v54_v46 = vld [vmem:[%s53_s25] sm:$0x1]  ;;  %51 = vst [vmem:[#allocation2 + $0x4] sm:$0x1] %v50_v45  ;;  %s57_s5 = scalar_lea.vmem [#allocation5], %s990_s30  ;;  %s996_s26 = sld [smem:[#allocation4 + $0xc]] }
  0x2e   :  { %1158 = vmatprep.subr.bf16.mxu0 %v1306_v0  ;;  %55 = vst [vmem:[#allocation2 + $0x5] sm:$0x1] %v54_v46  ;;  %v58_v3 = vld [vmem:[%s57_s5] sm:$0x1]  ;;  %s997_s27 = sld [smem:[#allocation4 + $0xd]]  ;;  %s998_s1 = sld [smem:[#allocation4 + $0xe]] }
  0x2f   :  { %s61_s6 = scalar_lea.vmem [#allocation5], %s991_s4  ;;  %59 = vst [vmem:[#allocation2 + $0x6] sm:$0x1] %v58_v3  ;;  %v66_v25 = vld [vmem:[%s65_s12] sm:$0x1]  ;;  %s999_s7 = sld [smem:[#allocation4 + $0xf]] }
  0x30   :  { %v62_v4 = vld [vmem:[%s61_s6] sm:$0x1]  ;;  %67 = vst [vmem:[#allocation2 + $0x8] sm:$0x1] %v66_v25  ;;  %s77_s21 = scalar_lea.vmem [#allocation5], %s995_s20 }
  0x31   :  { %1160 = vmatpush3.bf16.msra.mxu0 %v1367_v9  ;;  %v96_v10 = vld [vmem:[#allocation2] sm:$0x3]  ;;  %63 = vst [vmem:[#allocation2 + $0x7] sm:$0x1] %v62_v4 }
  0x32   :  { %1167 = vmatprep.subr.bf16.mxu0 %v1306_v0  ;;  %v70_v26 = vld [vmem:[%s69_s13] sm:$0x1] }
  0x33   :  { %v208_v30 = vld [vmem:[#allocation2 + $0x2] sm:$0x3]  ;;  %71 = vst [vmem:[#allocation2 + $0x9] sm:$0x1] %v70_v26  ;;  %v74_v45 = vld [vmem:[%s73_s0] sm:$0x1] }
  0x34   :  { %v78_v46 = vld [vmem:[%s77_s21] sm:$0x1]  ;;  %75 = vst [vmem:[#allocation2 + $0xa] sm:$0x1] %v74_v45  ;;  %s81_s28 = scalar_lea.vmem [#allocation5], %s996_s26  ;;  %s85_s29 = scalar_lea.vmem [#allocation5], %s997_s27 }
  0x35   :  { %v316_v50 = vld [vmem:[#allocation2 + $0x4] sm:$0x3]  ;;  %79 = vst [vmem:[#allocation2 + $0xb] sm:$0x1] %v78_v46  ;;  %s89_s8 = scalar_lea.vmem [#allocation5], %s998_s1  ;;  %s93_s9 = scalar_lea.vmem [#allocation5], %s999_s7 }
  0xff   :  { %v171_v11 = vpop.f32.mrb[0].mxu0 }
 0x100   :  { %v175_v12 = vadd.f32 %v171_v11, %v96_v10  ;;  %v1065_v13 = vpop.f32.mrb[1].mxu0  ;;  %v424_v10 = vld [vmem:[#allocation2 + $0x6] sm:$0x3] }
 0x102   :  { %1200 = vtanh.f32 %v175_v12  ;;  %v1000_v15 = vmul.f32 -1.442695, %v175_v12 }
 0x104   :  { %1202 = vpow2.f32 %v1000_v15 }
 0x10c   :  { %v1201_v14 = vpop.eup %1200 }
 0x10d   :  { %185 = vrot.lane.b32.xlu0 %v1201_v14, %s1309_s2 }
 0x10e   :  { %v1203_v16 = vpop.eup %1202 }
 0x10f   :  { %v179_v17 = vadd.f32 1.0, %v1203_v16 }
 0x111   :  { %1204 = vrcp.f32 %v179_v17 }
 0x11b   :  { %v1205_v18 = vpop.eup %1204 }
 0x11c   :  { %v183_v21 = vmul.f32 0.0, %v1205_v18 }
 0x17f   :  { %v186_v19 = vpop.permute.xlu0 %185 }
 0x180   :  { %v188_v20 = vmul.f32 %v1205_v18, %v186_v19 }
 0x182   :  { %190 = vrot.lane.b32.xlu0 %v188_v20, %s1309_s2 }
 0x1f4   :  { %v191_v22 = vpop.permute.xlu0 %190 }
 0x1f5   :  { %v193_v23 = vadd.f32 %v191_v22, %v183_v21 }
 0x1f7   :  { %1206 = vtanh.f32 %v193_v23 }
 0x201   :  { %v1207_v24 = vpop.eup %1206 }
 0x202   :  { %196 = vrot.lane.b32.xlu1 %v1207_v24, %s1309_s2 }
 0x274   :  { %v197_v27 = vpop.permute.xlu1 %196 }
 0x275   :  { %v199_v28 = vmul.f32 %v1205_v18, %v197_v27 }
 0x277   :  { %201 = vrot.lane.b32.xlu1 %v199_v28, %s1310_s18 }
 0x2e9   :  { %v202_v29 = vpop.permute.xlu1 %201 }
 0x2ea   :  { %205 = vst.msk [vmem:[%s1517_s3] sm:$0x1] %vm204_vm1, %v202_v29  ;;  %1075 = vmatmul.mubr.msk.f32.vlgmr.msra.gmra.mrb[0].mxu1 %vm101_vm3, %v202_v29 }
 0x2eb   :  { %207 = vst.msk [vmem:[%s1517_s3 + $0x7] sm:$0x2] %vm206_vm2, %v202_v29  ;;  %1163 = vmatpush3.bf16.msra.mxu1 %v1361_v5  ;;  %1096 = vmatprep.mubr.msk.f32.mxu1 %vm1307_vm0, %v1308_v1 }
 0x2ec   :  { %1164 = vmatprep.subr.bf16.mxu1 %v1306_v0 }
 0x2ef   :  { %1166 = vmatpush3.bf16.msra.mxu1 %v1367_v9 }
 0x2f0   :  { %1173 = vmatprep.subr.bf16.mxu1 %v1306_v0 }
 0x3bd   :  { %v281_v31 = vpop.f32.mrb[0].mxu1 }
 0x3be   :  { %v285_v32 = vadd.f32 %v281_v31, %v208_v30  ;;  %v1076_v33 = vpop.f32.mrb[1].mxu1  ;;  %v532_v30 = vld [vmem:[#allocation2 + $0x8] sm:$0x3] }
 0x3c0   :  { %1208 = vtanh.f32 %v285_v32  ;;  %v1002_v35 = vmul.f32 -1.442695, %v285_v32 }
 0x3c2   :  { %1210 = vpow2.f32 %v1002_v35 }
 0x3ca   :  { %v1209_v34 = vpop.eup %1208 }
 0x3cb   :  { %295 = vrot.lane.b32.xlu0 %v1209_v34, %s1309_s2 }
 0x3cc   :  { %v1211_v36 = vpop.eup %1210 }
 0x3cd   :  { %v289_v37 = vadd.f32 1.0, %v1211_v36 }
 0x3cf   :  { %1212 = vrcp.f32 %v289_v37 }
 0x3d9   :  { %v1213_v38 = vpop.eup %1212 }
 0x3da   :  { %v293_v41 = vmul.f32 %v1213_v38, %v193_v23 }
 0x43d   :  { %v296_v39 = vpop.permute.xlu0 %295 }
 0x43e   :  { %v298_v40 = vmul.f32 %v1213_v38, %v296_v39 }
 0x440   :  { %300 = vrot.lane.b32.xlu1 %v298_v40, %s1309_s2 }
 0x4b2   :  { %v301_v42 = vpop.permute.xlu1 %300 }
 0x4b3   :  { %v303_v43 = vadd.f32 %v301_v42, %v293_v41 }
 0x4b5   :  { %1214 = vtanh.f32 %v303_v43 }
 0x4bf   :  { %v1215_v44 = vpop.eup %1214 }
 0x4c0   :  { %306 = vrot.lane.b32.xlu0 %v1215_v44, %s1309_s2 }
 0x532   :  { %v307_v47 = vpop.permute.xlu0 %306 }
 0x533   :  { %v309_v48 = vmul.f32 %v1213_v38, %v307_v47 }
 0x535   :  { %311 = vrot.lane.b32.xlu1 %v309_v48, %s1310_s18 }
 0x5a7   :  { %v312_v49 = vpop.permute.xlu1 %311 }
 0x5a8   :  { %314 = vst.msk [vmem:[%s1517_s3 + $0x1] sm:$0x1] %vm204_vm1, %v312_v49  ;;  %1086 = vmatmul.mubr.msk.f32.vlgmr.msra.gmra.mrb[2].mxu0 %vm101_vm3, %v312_v49 }
 0x5a9   :  { %315 = vst.msk [vmem:[%s1517_s3 + $0x8] sm:$0x2] %vm206_vm2, %v312_v49  ;;  %1169 = vmatpush3.bf16.msra.mxu0 %v1361_v5  ;;  %1107 = vmatprep.mubr.msk.f32.mxu0 %vm1307_vm0, %v1308_v1 }
 0x5aa   :  { %1170 = vmatprep.subr.bf16.mxu0 %v1306_v0 }
 0x5ad   :  { %1172 = vmatpush3.bf16.msra.mxu0 %v1367_v9 }
 0x5ae   :  { %1179 = vmatprep.subr.bf16.mxu0 %v1306_v0 }
 0x67b   :  { %v389_v51 = vpop.f32.mrb[2].mxu0 }
 0x67c   :  { %v393_v52 = vadd.f32 %v389_v51, %v316_v50  ;;  %v1087_v53 = vpop.f32.mrb[3].mxu0  ;;  %v640_v50 = vld [vmem:[#allocation2 + $0xa] sm:$0x3] }
 0x67e   :  { %1216 = vtanh.f32 %v393_v52  ;;  %v1004_v55 = vmul.f32 -1.442695, %v393_v52 }
 0x680   :  { %1218 = vpow2.f32 %v1004_v55 }
 0x688   :  { %v1217_v54 = vpop.eup %1216 }
 0x689   :  { %403 = vrot.lane.b32.xlu0 %v1217_v54, %s1309_s2 }
 0x68a   :  { %v1219_v56 = vpop.eup %1218 }
 0x68b   :  { %v397_v57 = vadd.f32 1.0, %v1219_v56 }
 0x68d   :  { %1220 = vrcp.f32 %v397_v57 }
 0x697   :  { %v1221_v58 = vpop.eup %1220 }
 0x698   :  { %v401_v61 = vmul.f32 %v1221_v58, %v303_v43 }
 0x6fb   :  { %v404_v59 = vpop.permute.xlu0 %403 }
 0x6fc   :  { %v406_v60 = vmul.f32 %v1221_v58, %v404_v59 }
 0x6fe   :  { %408 = vrot.lane.b32.xlu1 %v406_v60, %s1309_s2 }
 0x770   :  { %v409_v62 = vpop.permute.xlu1 %408 }
 0x771   :  { %v411_v63 = vadd.f32 %v409_v62, %v401_v61  ;;  %v82_v61 = vld [vmem:[%s81_s28] sm:$0x1] }
 0x772   :  { %v86_v62 = vld [vmem:[%s85_s29] sm:$0x1]  ;;  %83 = vst [vmem:[#allocation2 + $0xc] sm:$0x1] %v82_v61 }
 0x773   :  { %1222 = vtanh.f32 %v411_v63  ;;  %87 = vst [vmem:[#allocation2 + $0xd] sm:$0x1] %v86_v62 }
 0x77a   :  { %v748_v4 = vld [vmem:[#allocation2 + $0xc] sm:$0x3] }
 0x77d   :  { %v1223_v2 = vpop.eup %1222 }
 0x77e   :  { %414 = vrot.lane.b32.xlu0 %v1223_v2, %s1309_s2 }
 0x7f0   :  { %v415_v6 = vpop.permute.xlu0 %414 }
 0x7f1   :  { %v417_v7 = vmul.f32 %v1221_v58, %v415_v6 }
 0x7f3   :  { %419 = vrot.lane.b32.xlu1 %v417_v7, %s1310_s18 }
 0x865   :  { %v420_v8 = vpop.permute.xlu1 %419 }
 0x866   :  { %422 = vst.msk [vmem:[%s1517_s3 + $0x2] sm:$0x1] %vm204_vm1, %v420_v8  ;;  %1097 = vmatmul.mubr.msk.f32.vlgmr.msra.gmra.mrb[2].mxu1 %vm101_vm3, %v420_v8 }
 0x867   :  { %423 = vst.msk [vmem:[%s1517_s3 + $0x9] sm:$0x2] %vm206_vm2, %v420_v8  ;;  %1175 = vmatpush3.bf16.msra.mxu1 %v1361_v5  ;;  %1118 = vmatprep.mubr.msk.f32.mxu1 %vm1307_vm0, %v1308_v1 }
 0x868   :  { %1176 = vmatprep.subr.bf16.mxu1 %v1306_v0 }
 0x86b   :  { %1178 = vmatpush3.bf16.msra.mxu1 %v1367_v9 }
 0x86c   :  { %1185 = vmatprep.subr.bf16.mxu1 %v1306_v0 }
 0x939   :  { %v497_v11 = vpop.f32.mrb[2].mxu1 }
 0x93a   :  { %v501_v12 = vadd.f32 %v497_v11, %v424_v10  ;;  %v1098_v13 = vpop.f32.mrb[3].mxu1 }
 0x93c   :  { %1224 = vtanh.f32 %v501_v12  ;;  %v1006_v15 = vmul.f32 -1.442695, %v501_v12 }
 0x93e   :  { %1226 = vpow2.f32 %v1006_v15 }
 0x946   :  { %v1225_v14 = vpop.eup %1224 }
 0x947   :  { %511 = vrot.lane.b32.xlu0 %v1225_v14, %s1309_s2 }
 0x948   :  { %v1227_v16 = vpop.eup %1226 }
 0x949   :  { %v505_v17 = vadd.f32 1.0, %v1227_v16 }
 0x94b   :  { %1228 = vrcp.f32 %v505_v17 }
 0x955   :  { %v1229_v18 = vpop.eup %1228 }
 0x956   :  { %v509_v21 = vmul.f32 %v1229_v18, %v411_v63 }
 0x9b9   :  { %v512_v19 = vpop.permute.xlu0 %511 }
 0x9ba   :  { %v514_v20 = vmul.f32 %v1229_v18, %v512_v19 }
 0x9bc   :  { %516 = vrot.lane.b32.xlu1 %v514_v20, %s1309_s2 }
 0xa2e   :  { %v517_v22 = vpop.permute.xlu1 %516 }
 0xa2f   :  { %v519_v23 = vadd.f32 %v517_v22, %v509_v21  ;;  %v90_v21 = vld [vmem:[%s89_s8] sm:$0x1] }
 0xa30   :  { %v94_v22 = vld [vmem:[%s93_s9] sm:$0x1]  ;;  %91 = vst [vmem:[#allocation2 + $0xe] sm:$0x1] %v90_v21 }
 0xa31   :  { %1230 = vtanh.f32 %v519_v23  ;;  %95 = vst [vmem:[#allocation2 + $0xf] sm:$0x1] %v94_v22 }
 0xa38   :  { %v856_v26 = vld [vmem:[#allocation2 + $0xe] sm:$0x3] }
 0xa3b   :  { %v1231_v24 = vpop.eup %1230 }
 0xa3c   :  { %522 = vrot.lane.b32.xlu0 %v1231_v24, %s1309_s2 }
 0xaae   :  { %v523_v27 = vpop.permute.xlu0 %522 }
 0xaaf   :  { %v525_v28 = vmul.f32 %v1229_v18, %v523_v27 }
 0xab1   :  { %527 = vrot.lane.b32.xlu1 %v525_v28, %s1310_s18 }
 0xb23   :  { %v528_v29 = vpop.permute.xlu1 %527 }
 0xb24   :  { %530 = vst.msk [vmem:[%s1517_s3 + $0x3] sm:$0x1] %vm204_vm1, %v528_v29  ;;  %1108 = vmatmul.mubr.msk.f32.vlgmr.msra.gmra.mrb[4].mxu0 %vm101_vm3, %v528_v29 }
 0xb25   :  { %531 = vst.msk [vmem:[%s1517_s3 + $0xa] sm:$0x2] %vm206_vm2, %v528_v29  ;;  %1181 = vmatpush3.bf16.msra.mxu0 %v1361_v5  ;;  %1129 = vmatprep.mubr.msk.f32.mxu0 %vm1307_vm0, %v1308_v1 }
 0xb26   :  { %1182 = vmatprep.subr.bf16.mxu0 %v1306_v0 }
 0xb29   :  { %1184 = vmatpush3.bf16.msra.mxu0 %v1367_v9 }
 0xbf7   :  { %v605_v31 = vpop.f32.mrb[4].mxu0 }
 0xbf8   :  { %v609_v32 = vadd.f32 %v605_v31, %v532_v30  ;;  %v1109_v33 = vpop.f32.mrb[5].mxu0 }
 0xbfa   :  { %1232 = vtanh.f32 %v609_v32  ;;  %v1008_v35 = vmul.f32 -1.442695, %v609_v32 }
 0xbfc   :  { %1234 = vpow2.f32 %v1008_v35 }
 0xc04   :  { %v1233_v34 = vpop.eup %1232 }
 0xc05   :  { %619 = vrot.lane.b32.xlu0 %v1233_v34, %s1309_s2 }
 0xc06   :  { %v1235_v36 = vpop.eup %1234 }
 0xc07   :  { %v613_v37 = vadd.f32 1.0, %v1235_v36 }
 0xc09   :  { %1236 = vrcp.f32 %v613_v37 }
 0xc13   :  { %v1237_v38 = vpop.eup %1236 }
 0xc14   :  { %v617_v41 = vmul.f32 %v1237_v38, %v519_v23 }
 0xc77   :  { %v620_v39 = vpop.permute.xlu0 %619 }
 0xc78   :  { %v622_v40 = vmul.f32 %v1237_v38, %v620_v39 }
 0xc7a   :  { %624 = vrot.lane.b32.xlu1 %v622_v40, %s1309_s2 }
 0xcec   :  { %v625_v42 = vpop.permute.xlu1 %624 }
 0xced   :  { %v627_v43 = vadd.f32 %v625_v42, %v617_v41 }
 0xcef   :  { %1238 = vtanh.f32 %v627_v43 }
 0xcf9   :  { %v1239_v44 = vpop.eup %1238 }
 0xcfa   :  { %630 = vrot.lane.b32.xlu0 %v1239_v44, %s1309_s2 }
 0xd6c   :  { %v631_v47 = vpop.permute.xlu0 %630 }
 0xd6d   :  { %v633_v48 = vmul.f32 %v1237_v38, %v631_v47 }
 0xd6f   :  { %635 = vrot.lane.b32.xlu1 %v633_v48, %s1310_s18 }
 0xde1   :  { %v636_v49 = vpop.permute.xlu1 %635 }
 0xde2   :  { %638 = vst.msk [vmem:[%s1517_s3 + $0x4] sm:$0x1] %vm204_vm1, %v636_v49  ;;  %1119 = vmatmul.mubr.msk.f32.vlgmr.msra.gmra.mrb[4].mxu1 %vm101_vm3, %v636_v49 }
 0xde3   :  { %639 = vst.msk [vmem:[%s1517_s3 + $0xb] sm:$0x2] %vm206_vm2, %v636_v49  ;;  %1187 = vmatpush3.bf16.msra.mxu1 %v1361_v5  ;;  %1140 = vmatprep.mubr.msk.f32.mxu1 %vm1307_vm0, %v1308_v1 }
 0xde4   :  { %1188 = vmatprep.subr.bf16.mxu1 %v1306_v0 }
 0xde7   :  { %1190 = vmatpush3.bf16.msra.mxu1 %v1367_v9 }
 0xeb5   :  { %v713_v51 = vpop.f32.mrb[4].mxu1 }
 0xeb6   :  { %v717_v52 = vadd.f32 %v713_v51, %v640_v50  ;;  %v1120_v53 = vpop.f32.mrb[5].mxu1 }
 0xeb8   :  { %1240 = vtanh.f32 %v717_v52  ;;  %v1010_v55 = vmul.f32 -1.442695, %v717_v52 }
 0xeba   :  { %1242 = vpow2.f32 %v1010_v55 }
 0xec2   :  { %v1241_v54 = vpop.eup %1240 }
 0xec3   :  { %727 = vrot.lane.b32.xlu0 %v1241_v54, %s1309_s2 }
 0xec4   :  { %v1243_v56 = vpop.eup %1242 }
 0xec5   :  { %v721_v57 = vadd.f32 1.0, %v1243_v56 }
 0xec7   :  { %1244 = vrcp.f32 %v721_v57 }
 0xed1   :  { %v1245_v5 = vpop.eup %1244 }
 0xed2   :  { %v725_v0 = vmul.f32 %v1245_v5, %v627_v43 }
 0xf35   :  { %v728_v58 = vpop.permute.xlu0 %727 }
 0xf36   :  { %v730_v1 = vmul.f32 %v1245_v5, %v728_v58 }
 0xf38   :  { %732 = vrot.lane.b32.xlu1 %v730_v1, %s1309_s2 }
 0xfaa   :  { %v733_v9 = vpop.permute.xlu1 %732 }
 0xfab   :  { %v735_v59 = vadd.f32 %v733_v9, %v725_v0 }
 0xfad   :  { %1246 = vtanh.f32 %v735_v59 }
 0xfb7   :  { %v1247_v60 = vpop.eup %1246 }
 0xfb8   :  { %738 = vrot.lane.b32.xlu0 %v1247_v60, %s1309_s2 }
0x102a   :  { %v739_v63 = vpop.permute.xlu0 %738 }
0x102b   :  { %v741_v2 = vmul.f32 %v1245_v5, %v739_v63 }
0x102d   :  { %743 = vrot.lane.b32.xlu1 %v741_v2, %s1310_s18 }
0x109f   :  { %v744_v3 = vpop.permute.xlu1 %743 }
0x10a0   :  { %746 = vst.msk [vmem:[%s1517_s3 + $0x5] sm:$0x1] %vm204_vm1, %v744_v3  ;;  %1130 = vmatmul.mubr.msk.f32.vlgmr.msra.gmra.mrb[6].mxu0 %vm101_vm3, %v744_v3 }
0x10a1   :  { %747 = vst.msk [vmem:[%s1517_s3 + $0xc] sm:$0x2] %vm206_vm2, %v744_v3 }
0x1173   :  { %v821_v6 = vpop.f32.mrb[6].mxu0 }
0x1174   :  { %v825_v7 = vadd.f32 %v821_v6, %v748_v4  ;;  %v1131_v8 = vpop.f32.mrb[7].mxu0 }
0x1176   :  { %1248 = vtanh.f32 %v825_v7  ;;  %v1012_v11 = vmul.f32 -1.442695, %v825_v7 }
0x1178   :  { %1250 = vpow2.f32 %v1012_v11 }
0x1180   :  { %v1249_v10 = vpop.eup %1248 }
0x1181   :  { %835 = vrot.lane.b32.xlu0 %v1249_v10, %s1309_s2 }
0x1182   :  { %v1251_v12 = vpop.eup %1250 }
0x1183   :  { %v829_v13 = vadd.f32 1.0, %v1251_v12 }
0x1185   :  { %1252 = vrcp.f32 %v829_v13 }
0x118f   :  { %v1253_v14 = vpop.eup %1252 }
0x1190   :  { %v833_v17 = vmul.f32 %v1253_v14, %v735_v59 }
0x11f3   :  { %v836_v15 = vpop.permute.xlu0 %835 }
0x11f4   :  { %v838_v16 = vmul.f32 %v1253_v14, %v836_v15 }
0x11f6   :  { %840 = vrot.lane.b32.xlu1 %v838_v16, %s1309_s2 }
0x1268   :  { %v841_v18 = vpop.permute.xlu1 %840 }
0x1269   :  { %v843_v19 = vadd.f32 %v841_v18, %v833_v17 }
0x126b   :  { %1254 = vtanh.f32 %v843_v19 }
0x1275   :  { %v1255_v20 = vpop.eup %1254 }
0x1276   :  { %846 = vrot.lane.b32.xlu0 %v1255_v20, %s1309_s2 }
0x12e8   :  { %v847_v23 = vpop.permute.xlu0 %846 }
0x12e9   :  { %v849_v24 = vmul.f32 %v1253_v14, %v847_v23 }
0x12eb   :  { %851 = vrot.lane.b32.xlu1 %v849_v24, %s1310_s18 }
0x135d   :  { %v852_v25 = vpop.permute.xlu1 %851 }
0x135e   :  { %854 = vst.msk [vmem:[%s1517_s3 + $0x6] sm:$0x1] %vm204_vm1, %v852_v25  ;;  %1141 = vmatmul.mubr.msk.f32.vlgmr.msra.gmra.mrb[6].mxu1 %vm101_vm3, %v852_v25 }
0x135f   :  { %855 = vst.msk [vmem:[%s1517_s3 + $0xd] sm:$0x2] %vm206_vm2, %v852_v25 }
0x1431   :  { %v929_v27 = vpop.f32.mrb[6].mxu1 }
0x1432   :  { %v933_v28 = vadd.f32 %v929_v27, %v856_v26  ;;  %v1142_v29 = vpop.f32.mrb[7].mxu1 }
0x1434   :  { %1256 = vtanh.f32 %v933_v28  ;;  %v1014_v31 = vmul.f32 -1.442695, %v933_v28 }
0x1436   :  { %1258 = vpow2.f32 %v1014_v31 }
0x143e   :  { %v1257_v30 = vpop.eup %1256 }
0x143f   :  { %943 = vrot.lane.b32.xlu0 %v1257_v30, %s1309_s2 }
0x1440   :  { %v1259_v32 = vpop.eup %1258 }
0x1441   :  { %v937_v33 = vadd.f32 1.0, %v1259_v32 }
0x1443   :  { %1260 = vrcp.f32 %v937_v33 }
0x144d   :  { %v1261_v34 = vpop.eup %1260 }
0x144e   :  { %v941_v37 = vmul.f32 %v1261_v34, %v843_v19 }
0x14b1   :  { %v944_v35 = vpop.permute.xlu0 %943 }
0x14b2   :  { %v946_v36 = vmul.f32 %v1261_v34, %v944_v35 }
0x14b4   :  { %948 = vrot.lane.b32.xlu1 %v946_v36, %s1309_s2 }
0x1526   :  { %v949_v38 = vpop.permute.xlu1 %948 }
0x1527   :  { %v951_v39 = vadd.f32 %v949_v38, %v941_v37 }
0x1529   :  { %1262 = vtanh.f32 %v951_v39 }
0x1533   :  { %v1263_v40 = vpop.eup %1262 }
0x1534   :  { %954 = vrot.lane.b32.xlu0 %v1263_v40, %s1309_s2 }
0x15a6   :  { %v955_v41 = vpop.permute.xlu0 %954 }
0x15a7   :  { %v957_v42 = vmul.f32 %v1261_v34, %v955_v41 }
0x15a9   :  { %959 = vrot.lane.b32.xlu1 %v957_v42, %s1310_s18 }
0x161b   :  { %v960_v43 = vpop.permute.xlu1 %959 }
0x161c   :  { %962 = vst.msk [vmem:[%s1517_s3 + $0x7] sm:$0x1] %vm204_vm1, %v960_v43 }
0x161d   :  { %963 = vst.msk [vmem:[%s1517_s3 + $0xe] sm:$0x2] %vm206_vm2, %v960_v43 }
0x161e   :  { %968 = vsyncpa [#allocation6], 1 }

</bundles_post_ra>
